<compile_context>
chip_gen: v7x
topology: tpu7x:2x2x1
jax: 0.10.0
libtpu: 0.0.40
codegen_flags: <defaults>
</compile_context>

<pallas_src>
import functools
import math

import jax
import jax.numpy as jnp
from jax.experimental import pallas as pl
from jax.experimental.pallas import tpu as pltpu

SELU_ALPHA = 1.6732632423543772848170429916717
SELU_SCALE = 1.0507009873554804934193349852946
HALF_LOG_2PI = 0.5 * math.log(2.0 * math.pi)
LANES = 128


def _selu(x):
    return SELU_SCALE * jnp.where(x > 0, x, SELU_ALPHA * (jnp.exp(x) - 1.0))


def _round_up(n, m):
    return ((n + m - 1) // m) * m


def _fused_actor_critic_kernel(obs_ref, act_ref, par_ref, out_ref, *,
                               obs_dim, act_dim, num_layers):
    """One grid step = `bt` batch rows.

    par_ref row layout (every row 128 lanes wide, zero padded):
      [0 : obs_dim]                      fused layer-0 weight (obs -> [actor|critic])
      (num_layers-1) x 128 rows          block-diagonal hidden/output weights
      num_layers rows                    fused biases
      1 row                              exp(-2*log_std)   (zero outside [0:A))
      1 row                              2*log_std         (zero outside [0:A))
    """
    h = obs_ref[...]                     # (bt, obs_dim) f32
    act = act_ref[...]                   # (bt, 128) f32, zero padded past act_dim

    off = 0
    weights = []
    for l in range(num_layers):
        rows = obs_dim if l == 0 else LANES
        weights.append(par_ref[off:off + rows, :])
        off += rows
    biases = []
    for _ in range(num_layers):
        biases.append(par_ref[off:off + 1, :])
        off += 1
    inv_s = par_ref[off:off + 1, :]      # exp(-2*log_std)
    off += 1
    log2s = par_ref[off:off + 1, :]      # 2*log_std

    # Fused actor||critic MLP.  Padding lanes stay exactly zero (SELU(0)=0).
    for l in range(num_layers):
        h = jnp.dot(h, weights[l], preferred_element_type=jnp.float32) + biases[l]
        if l < num_layers - 1:
            h = _selu(h)
    # h: (bt, 128) -- cols [0:A) = actions_mean, col A = value, rest = 0.

    # MultivariateNormal(scale_tril=diag(exp(log_std)^2)) log_prob:
    # per-dim scale s_i = exp(2*log_std_i).  inv_s is zero on padding lanes,
    # so the lane reduction only sees the A action dims.
    z = (act - h) * inv_s                                      # (bt, 128)
    quad = jnp.sum(z * z, axis=-1, keepdims=True)              # (bt, 1)
    sum_log_s = jnp.sum(log2s, axis=-1, keepdims=True)         # (1, 1)
    logp = -0.5 * quad - sum_log_s - act_dim * HALF_LOG_2PI    # (bt, 1)

    # Pack log_prob into lane A+1 of the lane-dense result block.
    col = jax.lax.broadcasted_iota(jnp.int32, h.shape, 1)
    out_ref[...] = jnp.where(col == act_dim + 1, logp, h)


def _pack_params(log_std, actor_params, critic_params, obs_dim, act_dim):
    """Build the single lane-dense parameter slab consumed by the kernel."""
    num_layers = len(actor_params)
    assert len(critic_params) == num_layers
    w_rows, b_rows = [], []
    for l, ((aw, ab), (cw, cb)) in enumerate(zip(actor_params, critic_params)):
        aw = jnp.asarray(aw, jnp.float32)
        ab = jnp.asarray(ab, jnp.float32).reshape(-1)
        cw = jnp.asarray(cw, jnp.float32)
        cb = jnp.asarray(cb, jnp.float32).reshape(-1)
        a_in, a_out = aw.shape
        c_in, c_out = cw.shape
        assert a_out + c_out <= LANES and a_in + c_in <= LANES
        if l == num_layers - 1:
            assert a_out == act_dim and c_out == 1
        if l == 0:
            assert a_in == obs_dim and c_in == obs_dim
            w = jnp.zeros((obs_dim, LANES), jnp.float32)
            w = w.at[:, :a_out].set(aw)
            w = w.at[:, a_out:a_out + c_out].set(cw)
        else:
            w = jnp.zeros((LANES, LANES), jnp.float32)
            w = w.at[:a_in, :a_out].set(aw)
            w = w.at[a_in:a_in + c_in, a_out:a_out + c_out].set(cw)
        b = jnp.zeros((1, LANES), jnp.float32)
        b = b.at[0, :a_out].set(ab)
        b = b.at[0, a_out:a_out + c_out].set(cb)
        w_rows.append(w)
        b_rows.append(b)

    log_std = jnp.asarray(log_std, jnp.float32).reshape(-1)
    inv_s = jnp.zeros((1, LANES), jnp.float32).at[0, :act_dim].set(
        jnp.exp(-2.0 * log_std))
    log2s = jnp.zeros((1, LANES), jnp.float32).at[0, :act_dim].set(
        2.0 * log_std)

    slab = jnp.concatenate(w_rows + b_rows + [inv_s, log2s], axis=0)
    pad = (-slab.shape[0]) % 8
    if pad:
        slab = jnp.concatenate(
            [slab, jnp.zeros((pad, LANES), jnp.float32)], axis=0)
    return slab, num_layers


def actor_critic_forward(observations, actions, log_std, actor_params,
                         critic_params, *, block_rows=256):
    """Returns (actions_log_prob [B], entropy [B], value [B,1],
    actions_mean [B,A], log_std_rep [B,A]) -- matching ActorCritic.forward."""
    B, obs_dim = observations.shape
    act_dim = actions.shape[-1]
    assert act_dim + 2 <= LANES

    slab, num_layers = _pack_params(log_std, actor_params, critic_params,
                                    obs_dim, act_dim)
    slab_rows = slab.shape[0]

    # Batch tiling: pad B up to a multiple of the (8-aligned) row tile.
    bt = _round_up(min(block_rows, _round_up(B, 8)), 8)
    bp = _round_up(B, bt)

    obs_p = jnp.zeros((bp, obs_dim), jnp.float32).at[:B].set(
        observations.astype(jnp.float32))
    act_p = jnp.zeros((bp, LANES), jnp.float32).at[:B, :act_dim].set(
        actions.astype(jnp.float32))

    kernel = functools.partial(_fused_actor_critic_kernel,
                               obs_dim=obs_dim, act_dim=act_dim,
                               num_layers=num_layers)

    packed = pl.pallas_call(
        kernel,
        grid=(bp // bt,),
        in_specs=[
            pl.BlockSpec((bt, obs_dim), lambda i: (i, 0)),
            pl.BlockSpec((bt, LANES), lambda i: (i, 0)),
            pl.BlockSpec((slab_rows, LANES), lambda i: (0, 0)),  # resident params
        ],
        out_specs=pl.BlockSpec((bt, LANES), lambda i: (i, 0)),
        out_shape=jax.ShapeDtypeStruct((bp, LANES), jnp.float32),
        compiler_params=pltpu.CompilerParams(
            dimension_semantics=("parallel",),
            vmem_limit_bytes=64 * 1024 * 1024,
        ),
    )(obs_p, act_p, slab)

    mean = packed[:B, :act_dim]
    value = packed[:B, act_dim:act_dim + 1]
    logp = packed[:B, act_dim + 1]

    # Batch-constant terms: no per-row compute, so they stay out of the kernel.
    log_std = jnp.asarray(log_std, jnp.float32).reshape(-1)
    entropy = jnp.full(
        (B,),
        0.5 * act_dim * (1.0 + math.log(2.0 * math.pi)) + jnp.sum(2.0 * log_std),
        jnp.float32)
    lsrep = jnp.broadcast_to(log_std[None, :], (B, act_dim))

    return logp, entropy, value, mean, lsrep


def _reference_forward(observations, actions, log_std, actor_params,
                       critic_params):
    """Plain-JAX reference reproducing the PyTorch semantics."""
    def mlp(x, params):
        for i, (w, b) in enumerate(params):
            x = x @ w + b
            if i < len(params) - 1:
                x = _selu(x)
        return x

    mean = mlp(observations, actor_params)
    value = mlp(observations, critic_params)
    A = mean.shape[-1]
    log_s = 2.0 * log_std
    z = (actions - mean) * jnp.exp(-log_s)
    logp = -0.5 * jnp.sum(z * z, -1) - jnp.sum(log_s) - A * HALF_LOG_2PI
    ent = jnp.full((mean.shape[0],),
                   0.5 * A * (1.0 + math.log(2.0 * math.pi)) + jnp.sum(log_s))
    lsrep = jnp.broadcast_to(log_std[None, :], mean.shape)
    return logp, ent, value, mean, lsrep


if __name__ == "__main__":
    # Config consistent with the module:
    #   obs_shape=(32,), actions_shape=(8,), pi_hid_sizes=vf_hid_sizes=[32,32]
    #   action_noise_cfg={'type': 'learned'}, initial_std=0.8
    B, OBS, HID, ACT = 64, 32, 32, 8
    initial_std = 0.8

    key = jax.random.PRNGKey(0)
    keys = jax.random.split(key, 16)

    def lin(kw, kb, fan_in, fan_out, gain):
        # Deterministic synthetic init (stands in for orthogonal_ with `gain`).
        # TODO(synk): exact torch.nn.init.orthogonal_ not reproduced; scale matches.
        w = gain * jax.random.normal(kw, (fan_in, fan_out), jnp.float32) / jnp.sqrt(fan_in)
        b = 0.05 * jax.random.normal(kb, (fan_out,), jnp.float32)
        return w, b

    g = math.sqrt(2.0)
    actor_params = [
        lin(keys[0], keys[1], OBS, HID, g),
        lin(keys[2], keys[3], HID, HID, g),
        lin(keys[4], keys[5], HID, ACT, 0.01),
    ]
    critic_params = [
        lin(keys[6], keys[7], OBS, HID, g),
        lin(keys[8], keys[9], HID, HID, g),
        lin(keys[10], keys[11], HID, 1, 1.0),
    ]
    log_std = (math.log(initial_std)
               + 0.1 * jax.random.normal(keys[14], (ACT,), jnp.float32))

    observations = jax.random.normal(keys[12], (B, OBS), jnp.float32)
    actions = jax.random.normal(keys[13], (B, ACT), jnp.float32)

    outs = actor_critic_forward(observations, actions, log_std,
                                actor_params, critic_params,
                                block_rows=32)   # grid=(2,) exercises tiling
    outs = jax.block_until_ready(outs)

    ref = _reference_forward(observations, actions, log_std,
                             actor_params, critic_params)
    names = ["log_prob", "entropy", "value", "mean", "log_std_rep"]
    for name, got, want in zip(names, outs, ref):
        assert got.shape == want.shape, (name, got.shape, want.shape)
        assert jnp.allclose(got, want, atol=5e-4, rtol=5e-4), name

    print("KERNEL_OK")
</pallas_src>

<mosaic_0001>
module attributes {stable_mosaic.version = 11 : i64} {
  func.func @_fused_actor_critic_kernel(%arg0: i32, %arg1: memref<32x32xf32, #tpu.memory_space<vmem>>, %arg2: memref<32x128xf32, #tpu.memory_space<vmem>>, %arg3: memref<296x128xf32, #tpu.memory_space<vmem>>, %arg4: memref<32x128xf32, #tpu.memory_space<vmem>>) attributes {dimension_semantics = [#tpu.dimension_semantics<parallel>], iteration_bounds = array<i64: 2>, scalar_prefetch = 0 : i64, scratch_operands = 0 : i64, tpu.core_type = #tpu.core_type<tc>, window_params = [{transform_indices = @transform_0, window_bounds = array<i64: 32, 32>}, {transform_indices = @transform_1, window_bounds = array<i64: 32, 128>}, {pipeline_mode = #tpu.pipeline_mode<synchronous>, transform_indices = @transform_2, window_bounds = array<i64: 296, 128>}, {transform_indices = @transform_3, window_bounds = array<i64: 32, 128>}]} {
    %c0 = arith.constant 0 : index
    %c0_0 = arith.constant 0 : index
    %0 = vector.load %arg1[%c0, %c0_0] : memref<32x32xf32, #tpu.memory_space<vmem>>, vector<32x32xf32>
    %c0_1 = arith.constant 0 : index
    %c0_2 = arith.constant 0 : index
    %1 = vector.load %arg2[%c0_1, %c0_2] : memref<32x128xf32, #tpu.memory_space<vmem>>, vector<32x128xf32>
    %c0_3 = arith.constant 0 : index
    %c0_4 = arith.constant 0 : index
    %2 = vector.load %arg3[%c0_3, %c0_4] : memref<296x128xf32, #tpu.memory_space<vmem>>, vector<32x128xf32>
    %c32 = arith.constant 32 : index
    %c0_5 = arith.constant 0 : index
    %3 = vector.load %arg3[%c32, %c0_5] : memref<296x128xf32, #tpu.memory_space<vmem>>, vector<128x128xf32>
    %c160 = arith.constant 160 : index
    %c0_6 = arith.constant 0 : index
    %4 = vector.load %arg3[%c160, %c0_6] : memref<296x128xf32, #tpu.memory_space<vmem>>, vector<128x128xf32>
    %c288 = arith.constant 288 : index
    %c0_7 = arith.constant 0 : index
    %5 = vector.load %arg3[%c288, %c0_7] : memref<296x128xf32, #tpu.memory_space<vmem>>, vector<1x128xf32>
    %c289 = arith.constant 289 : index
    %c0_8 = arith.constant 0 : index
    %6 = vector.load %arg3[%c289, %c0_8] : memref<296x128xf32, #tpu.memory_space<vmem>>, vector<1x128xf32>
    %c290 = arith.constant 290 : index
    %c0_9 = arith.constant 0 : index
    %7 = vector.load %arg3[%c290, %c0_9] : memref<296x128xf32, #tpu.memory_space<vmem>>, vector<1x128xf32>
    %c291 = arith.constant 291 : index
    %c0_10 = arith.constant 0 : index
    %8 = vector.load %arg3[%c291, %c0_10] : memref<296x128xf32, #tpu.memory_space<vmem>>, vector<1x128xf32>
    %c292 = arith.constant 292 : index
    %c0_11 = arith.constant 0 : index
    %9 = vector.load %arg3[%c292, %c0_11] : memref<296x128xf32, #tpu.memory_space<vmem>>, vector<1x128xf32>
    %cst = arith.constant dense<0.000000e+00> : vector<32x128xf32>
    %10 = tpu.matmul %0, %2, %cst {dimension_numbers = #tpu.dot_dimension_numbers<[1], [0], [0], [1], [0, 0, 1, 1], [], []>} : vector<32x32xf32>, vector<32x128xf32>, vector<32x128xf32> -> vector<32x128xf32>
    %11 = vector.broadcast %5 : vector<1x128xf32> to vector<32x128xf32>
    %12 = arith.addf %10, %11 : vector<32x128xf32>
    %cst_12 = arith.constant 0.000000e+00 : f32
    %13 = vector.broadcast %cst_12 : f32 to vector<32x128xf32>
    %14 = arith.cmpf ogt, %12, %13 : vector<32x128xf32>
    %15 = math.exp %12 : vector<32x128xf32>
    %cst_13 = arith.constant 1.000000e+00 : f32
    %16 = vector.broadcast %cst_13 : f32 to vector<32x128xf32>
    %17 = arith.subf %15, %16 : vector<32x128xf32>
    %cst_14 = arith.constant 1.67326319 : f32
    %18 = vector.broadcast %cst_14 : f32 to vector<32x128xf32>
    %19 = arith.mulf %18, %17 : vector<32x128xf32>
    %20 = arith.select %14, %12, %19 : vector<32x128xi1>, vector<32x128xf32>
    %cst_15 = arith.constant 1.05070102 : f32
    %21 = vector.broadcast %cst_15 : f32 to vector<32x128xf32>
    %22 = arith.mulf %21, %20 : vector<32x128xf32>
    %cst_16 = arith.constant dense<0.000000e+00> : vector<32x128xf32>
    %23 = tpu.matmul %22, %3, %cst_16 {dimension_numbers = #tpu.dot_dimension_numbers<[1], [0], [0], [1], [0, 0, 1, 1], [], []>} : vector<32x128xf32>, vector<128x128xf32>, vector<32x128xf32> -> vector<32x128xf32>
    %24 = vector.broadcast %6 : vector<1x128xf32> to vector<32x128xf32>
    %25 = arith.addf %23, %24 : vector<32x128xf32>
    %cst_17 = arith.constant 0.000000e+00 : f32
    %26 = vector.broadcast %cst_17 : f32 to vector<32x128xf32>
    %27 = arith.cmpf ogt, %25, %26 : vector<32x128xf32>
    %28 = math.exp %25 : vector<32x128xf32>
    %cst_18 = arith.constant 1.000000e+00 : f32
    %29 = vector.broadcast %cst_18 : f32 to vector<32x128xf32>
    %30 = arith.subf %28, %29 : vector<32x128xf32>
    %cst_19 = arith.constant 1.67326319 : f32
    %31 = vector.broadcast %cst_19 : f32 to vector<32x128xf32>
    %32 = arith.mulf %31, %30 : vector<32x128xf32>
    %33 = arith.select %27, %25, %32 : vector<32x128xi1>, vector<32x128xf32>
    %cst_20 = arith.constant 1.05070102 : f32
    %34 = vector.broadcast %cst_20 : f32 to vector<32x128xf32>
    %35 = arith.mulf %34, %33 : vector<32x128xf32>
    %cst_21 = arith.constant dense<0.000000e+00> : vector<32x128xf32>
    %36 = tpu.matmul %35, %4, %cst_21 {dimension_numbers = #tpu.dot_dimension_numbers<[1], [0], [0], [1], [0, 0, 1, 1], [], []>} : vector<32x128xf32>, vector<128x128xf32>, vector<32x128xf32> -> vector<32x128xf32>
    %37 = vector.broadcast %7 : vector<1x128xf32> to vector<32x128xf32>
    %38 = arith.addf %36, %37 : vector<32x128xf32>
    %39 = arith.subf %1, %38 : vector<32x128xf32>
    %40 = vector.broadcast %8 : vector<1x128xf32> to vector<32x128xf32>
    %41 = arith.mulf %39, %40 : vector<32x128xf32>
    %42 = arith.mulf %41, %41 : vector<32x128xf32>
    %cst_22 = arith.constant dense<0.000000e+00> : vector<32xf32>
    %43 = vector.multi_reduction <add>, %42, %cst_22 [1] : vector<32x128xf32> to vector<32xf32>
    %44 = vector.shape_cast %43 : vector<32xf32> to vector<32x1xf32>
    %cst_23 = arith.constant dense<0.000000e+00> : vector<1xf32>
    %45 = vector.multi_reduction <add>, %9, %cst_23 [1] : vector<1x128xf32> to vector<1xf32>
    %46 = vector.shape_cast %45 : vector<1xf32> to vector<1x1xf32>
    %cst_24 = arith.constant -5.000000e-01 : f32
    %47 = vector.broadcast %cst_24 : f32 to vector<32x1xf32>
    %48 = arith.mulf %47, %44 : vector<32x1xf32>
    %49 = vector.broadcast %46 : vector<1x1xf32> to vector<32x1xf32>
    %50 = arith.subf %48, %49 : vector<32x1xf32>
    %cst_25 = arith.constant 7.35150814 : f32
    %51 = vector.broadcast %cst_25 : f32 to vector<32x1xf32>
    %52 = arith.subf %50, %51 : vector<32x1xf32>
    %53 = tpu.iota {dimensions = array<i32: 1>} : vector<32x128xi32>
    %c9_i32 = arith.constant 9 : i32
    %54 = vector.broadcast %c9_i32 : i32 to vector<32x128xi32>
    %55 = arith.cmpi eq, %53, %54 : vector<32x128xi32>
    %56 = vector.shape_cast %52 : vector<32x1xf32> to vector<32x1xf32>
    %57 = vector.broadcast %56 : vector<32x1xf32> to vector<32x128xf32>
    %58 = arith.select %55, %57, %38 : vector<32x128xi1>, vector<32x128xf32>
    %c0_26 = arith.constant 0 : index
    %c0_27 = arith.constant 0 : index
    %59 = vector.load %arg4[%c0_26, %c0_27] : memref<32x128xf32, #tpu.memory_space<vmem>>, vector<32x128xf32>
    tpu.vector_store %arg4[%c0_26, %c0_27], %58 {strides = array<i32>} : memref<32x128xf32, #tpu.memory_space<vmem>>, vector<32x128xf32>,
    return
  }
  func.func @transform_0(%arg0: i32) -> (i32, i32) {
    %c0_i32 = arith.constant 0 : i32
    %c0_i32_0 = arith.constant 0 : i32
    return %arg0, %c0_i32 : i32, i32
  }
  func.func @transform_1(%arg0: i32) -> (i32, i32) {
    %c0_i32 = arith.constant 0 : i32
    %c0_i32_0 = arith.constant 0 : i32
    return %arg0, %c0_i32 : i32, i32
  }
  func.func @transform_2(%arg0: i32) -> (i32, i32) {
    %c0_i32 = arith.constant 0 : i32
    %c0_i32_0 = arith.constant 0 : i32
    %c0_i32_1 = arith.constant 0 : i32
    return %c0_i32, %c0_i32_0 : i32, i32
  }
  func.func @transform_3(%arg0: i32) -> (i32, i32) {
    %c0_i32 = arith.constant 0 : i32
    %c0_i32_0 = arith.constant 0 : i32
    return %arg0, %c0_i32 : i32, i32
  }
}

</mosaic_0001>

<bundles_post_ra>
// kernel: tpu_custom_call.1
= control target key start
LH: loop header
LB: loop body
LE: loop exit
PB: predicated region body
PF: predicated region fallthrough
CT: control target
= control target key end

     0   :  { %s1606_s0 = inlined_call_operand.hbm [shape: f32[64,32], index: 0, kind: input, shape index: {}]   ;;  %s1607_s1 = inlined_call_operand.hbm [shape: f32[64,128], index: 1, kind: input, shape index: {}]   ;;  %s1608_s2 = inlined_call_operand.hbm [shape: f32[296,128], index: 2, kind: input, shape index: {}]   ;;  %s1609_s3 = inlined_call_operand.hbm [shape: f32[64,128], index: 3, kind: output, shape index: {}]  }
   0x1   :  { %1617 = sst [smem:[#allocation13_spill]] %s1606_s0 }
   0x2   :  { %1618 = sst [smem:[#allocation14_spill]] %s1608_s2 }
   0x3   :  { %8 = vsyncpa [#allocation3], 0 }
   0x4   :  { %10 = vsyncpa [#allocation3 + $0x1], 0 }
   0x5   :  { %11 = vsyncpa [#allocation6], 0 }
   0x6   :  { %13 = vsyncpa [#allocation6 + $0x1], 0 }
   0x7   :  { %14 = vsyncpa [#allocation4], 0 }
   0x8   :  { %16 = vsyncpa [#allocation4 + $0x1], 0  ;;  %s1332_s12 = smov 0   ;;  %s1334_s13 = smov 0  }
   0x9   :  { %s1336_s14 = smov 0   ;;  %s1338_s15 = smov 0  }
   0xa LB: > { %s1353_s16 = sadd.s32 4294967295, %s1302_s15   ;;  %s805_s17 = sadd.s32 4294967294, %s1302_s15   ;;  %s1302_s15 = sphi %s1338_s15, %s1639_s15   ;;  %s1298_s14 = sphi %s1336_s14, %s1638_s14   ;;  %s1294_s13 = sphi %s1334_s13, %s1637_s13   ;;  %s1290_s12 = sphi %s1332_s12, %s1636_s12  }
   0xb   : > { %p42_p0 = scmp.ne.s32.totalorder %s1294_s13, %s1290_s12  ;;  %p1610_p1 = scmp.eq.s32.totalorder %s1353_s16, 0 }
   0xc   : > { %p119_p3 = scmp.eq.s32.totalorder %s805_s17, 1  ;;  %p806_p5 = scmp.ge.s32.totalorder %s1302_s15, 1 }
   0xd   : > { %p1362_p4 = por %p1610_p1, %p42_p0  ;;  %p126_p7 = scmp.lt.s32.totalorder %s1302_s15, 3 }
   0xe   : > { %p1367_p6 = por %p119_p3, %p42_p0  ;;  %s1304_s21 = smov [#allocation7]  }
   0xf   : > { %s1619_s18 = scalar_select %p1362_p4, 1, 0 }
  0x10   : > { %s1620_s19 = scalar_select %p1367_p6, 1, 0 }
  0x11   : > { %p1372_p8 = pnand %p806_p5, %p126_p7  ;;  %s138_s22 = sshll.u32 %s1304_s21, 4  ;;  %s1376_s22 = int_to_ptr.vmem [resolvable:$true] %s138_s22 }
  0x12   : > { %s1388_s24 = sadd.s32 1, %s1302_s15   ;;  %s29_s25 = sadd.s32 1, %s1298_s14 }
  0x13   : > { %s1621_s20 = scalar_select %p1372_p8, 1, 0 }
  0x14   : > { %p1068_p9 = pneg %p1372_p8  ;;  %s26_s26 = ssub.s32 %s1302_s15, %s1388_s24 }
  0x15   : > { %s1623_s2 = sld [smem:[#allocation14_spill]] }
  0x16   : > { %p1383_p11 = pnand %p1068_p9, %p1610_p1 }
  0x18   : > { %p1142_p13 = pneg %p1383_p11 }
  0x1b   : > { %s1140_s29 = scalar_lea.hbm %s1623_s2, 4736 }
  0x1c   : > { %p1141_p12 = scmp.ne.s32.totalorder %s1623_s2, %s1140_s29  ;;  %p1147_p5 = scmp.lt.u32.totalorder %s1140_s29, %s1623_s2 }
  0x1e   : > { %p1143_p0 = pnand %p1142_p13, %p1141_p12 }
  0x20   : > { %p1144_p3 = pneg %p1143_p0 }
  0x22   : > { %p1149_p7 = pnand %p1147_p5, %p1144_p3 }
  0x24   : > { %1152 = shalt.err (!%p1149_p7)
}
  0x25   : > { %s1153_s7 = scalar_lea.vmem %s1376_s22, 4736  ;;  %p1161_p2 = scmp.lt.s32.totalorder %s1376_s22, %s1376_s22 }
  0x26   : > { %p1154_p9 = scmp.ne.s32.totalorder %s1376_s22, %s1153_s7  ;;  %p1162_p6 = scmp.lt.s32.totalorder %s1153_s7, %s1153_s7 }
  0x28   : > { %p1156_p10 = pnand %p1154_p9, %p1142_p13  ;;  %p1163_p4 = por %p1162_p6, %p1161_p2 }
  0x2a   : > { %p1157_p1 = pneg %p1156_p10 }
  0x2c   : > { %p1164_p8 = pnand %p1163_p4, %p1157_p1 }
  0x2e   : > { %1167 = shalt.err (!%p1164_p8)
}
  0x2f   : > { %s1613_s8 = smov 128   ;;  %s1615_s9 = smov 8  }
  0x30   : > { %1071 = dma.hbm_to_vmem [thread:$0]  (!%p1383_p11), %s1623_s2, 4736, %s1376_s22, [#allocation6], %s1613_s8, %s1613_s8, %s1615_s9  }
  0x31   : > { %p27_p1 = scmp.eq.s32.totalorder %s26_s26, 0  ;;  %p36_p2 = scmp.ne.s32.totalorder %s1298_s14, %s1294_s13 }
  0x32   : > { %p37_p4 = scmp.eq.s32.totalorder %s1302_s15, 0  ;;  %p1084_p6 = scmp.lt.s32.totalorder %s1302_s15, 2 }
  0x33   : > { %s1422_s17 = scalar_select %p27_p1, %s1298_s14, %s29_s25  }
  0x34   : > { %p38_p8 = por %p37_p4, %p36_p2  ;;  %p1624_p10 = scmp.eq.s32.totalorder %s1353_s16, 1 }
  0x35   : > { %s152_s23 = sand.u32 1, %s1298_s14   ;;  %s845_s27 = sshll.u32 %s1302_s15, 9 }
  0x36   : > { %p1426_p12 = por %p1624_p10, %p36_p2  ;;  %s1432_s28 = sshll.u32 %s152_s23, 5 }
  0x37   : > { %s1626_s0 = sld [smem:[#allocation13_spill]]  ;;  %s156_s25 = scalar_lea.vmem [#allocation2], %s1432_s28 }
  0x38   : > { %s163_s26 = sshll.u32 %s156_s25, 4  ;;  %p1440_p11 = pnand %p1084_p6, %p38_p8  ;;  %s1444_s26 = int_to_ptr.vmem [resolvable:$true] %s163_s26 }
  0x39   : > { %s1449_s7 = scalar_lea.hbm %s1607_s1, %s845_s27  ;;  %s1451_s10 = scalar_lea.sflag [#allocation3], %s152_s23 }
  0x3a   : > { %p1170_p0 = pneg %p1440_p11 }
  0x3d   : > { %s1437_s22 = scalar_lea.hbm %s1626_s0, %s845_s27  ;;  %s1173_s25 = scalar_lea.hbm %s1626_s0, 1024 }
  0x3e   : > { %s1168_s11 = scalar_lea.hbm %s1437_s22, 512  ;;  %p1174_p7 = scmp.lt.u32.totalorder %s1437_s22, %s1626_s0 }
  0x3f   : > { %p1169_p13 = scmp.ne.s32.totalorder %s1437_s22, %s1168_s11  ;;  %p1175_p9 = scmp.lt.u32.totalorder %s1173_s25, %s1168_s11 }
  0x40   : > { %p1177_p2 = scmp.lt.u32.totalorder %s1168_s11, %s1437_s22 }
  0x41   : > { %p1171_p3 = pnand %p1170_p0, %p1169_p13  ;;  %p1176_p1 = por %p1175_p9, %p1174_p7 }
  0x43   : > { %p1172_p5 = pneg %p1171_p3  ;;  %p1178_p4 = por %p1177_p2, %p1176_p1 }
  0x45   : > { %p1179_p6 = pnand %p1178_p4, %p1172_p5 }
  0x47   : > { %1182 = shalt.err (!%p1179_p6)
}
  0x48   : > { %s1183_s23 = scalar_lea.vmem %s1444_s26, 512  ;;  %s1307_s27 = smov [#allocation2]  }
  0x49   : > { %p1184_p8 = scmp.ne.s32.totalorder %s1444_s26, %s1183_s23  ;;  %s1188_s5 = sshll.u32 %s1307_s27, 4  ;;  %s1189_s5 = int_to_ptr.vmem [resolvable:$false] %s1188_s5 }
  0x4a   : > { %s1190_s8 = scalar_lea.vmem %s1189_s5, 1024  ;;  %p1191_p3 = scmp.lt.s32.totalorder %s1444_s26, %s1189_s5 }
  0x4b   : > { %p1186_p10 = pnand %p1184_p8, %p1170_p0  ;;  %p1192_p7 = scmp.lt.s32.totalorder %s1190_s8, %s1183_s23 }
  0x4d   : > { %p1187_p13 = pneg %p1186_p10  ;;  %p1193_p9 = por %p1192_p7, %p1191_p3 }
  0x4f   : > { %p1194_p1 = pnand %p1193_p9, %p1187_p13 }
  0x51   : > { %1197 = shalt.err (!%p1194_p1)
}
  0x52   : > { %s1628_s9 = smov 8   ;;  %s1629_s6 = smov 128  }
  0x53   : > { %1075 = dma.hbm_to_vmem [thread:$0]  (!%p1440_p11), %s1437_s22, 512, %s1444_s26, %s1451_s10, %s1629_s6, %s1629_s6, %s1628_s9  }
  0x54   : > { %s177_s11 = scalar_lea.vmem [#allocation5], %s1432_s28  ;;  %s173_s30 = sand.u32 1, %s1302_s15  }
  0x55   : > { %s184_s29 = sshll.u32 %s177_s11, 4  ;;  %s1486_s25 = scalar_lea.sflag [#allocation6], %s173_s30  ;;  %s1484_s29 = int_to_ptr.vmem [resolvable:$true] %s184_s29 }
  0x56   : > { %s1198_s23 = scalar_lea.hbm %s1449_s7, 512  ;;  %s1203_s8 = scalar_lea.hbm %s1607_s1, 1024 }
  0x57   : > { %p1199_p5 = scmp.ne.s32.totalorder %s1449_s7, %s1198_s23  ;;  %p1204_p6 = scmp.lt.u32.totalorder %s1449_s7, %s1607_s1 }
  0x58   : > { %p1205_p8 = scmp.lt.u32.totalorder %s1203_s8, %s1198_s23  ;;  %p1207_p13 = scmp.lt.u32.totalorder %s1198_s23, %s1449_s7 }
  0x59   : > { %p1201_p2 = pnand %p1199_p5, %p1170_p0 }
  0x5a   : > { %p1206_p10 = por %p1205_p8, %p1204_p6 }
  0x5b   : > { %p1202_p4 = pneg %p1201_p2 }
  0x5c   : > { %p1208_p3 = por %p1207_p13, %p1206_p10 }
  0x5e   : > { %p1209_p7 = pnand %p1208_p3, %p1202_p4 }
  0x60   : > { %1212 = shalt.err (!%p1209_p7)
}
  0x61   : > { %s1213_s28 = scalar_lea.vmem %s1484_s29, 512  ;;  %s1308_s22 = smov [#allocation5]  }
  0x62   : > { %p1214_p9 = scmp.ne.s32.totalorder %s1484_s29, %s1213_s28  ;;  %s1218_s26 = sshll.u32 %s1308_s22, 4  ;;  %s1219_s26 = int_to_ptr.vmem [resolvable:$false] %s1218_s26 }
  0x63   : > { %s1220_s0 = scalar_lea.vmem %s1219_s26, 1024  ;;  %p1221_p2 = scmp.lt.s32.totalorder %s1484_s29, %s1219_s26 }
  0x64   : > { %p1216_p1 = pnand %p1214_p9, %p1170_p0  ;;  %p1222_p6 = scmp.lt.s32.totalorder %s1220_s0, %s1213_s28 }
  0x66   : > { %p1217_p5 = pneg %p1216_p1  ;;  %p1223_p8 = por %p1222_p6, %p1221_p2 }
  0x68   : > { %p1224_p10 = pnand %p1223_p8, %p1217_p5 }
  0x6a   : > { %1227 = shalt.err (!%p1224_p10)
}
  0x6b   : > { %1078 = dma.hbm_to_vmem [thread:$0]  (!%p1440_p11), %s1449_s7, 512, %s1484_s29, %s1486_s25, %s1629_s6, %s1629_s6, %s1628_s9  }
  0x6c   : > { %p1630_p0 = scmp.ne.s32.totalorder %s1621_s20, 0 }
  0x6d   : > { %s1518_s2 = sand.u32 (!%p1630_p0), 1, %s1294_s13   ;;  %p1631_p4 = scmp.ne.s32.totalorder (!%p1630_p0), %s1619_s18, 0 }
  0x6e   : > { %196 = sbr.rel (%p1630_p0) target bundleno = 1000 (0x3e8), region = 32  ;;  %s1521_s10 = sshll.u32 (!%p1630_p0), %s1518_s2, 5 }
  0x6f   : > { %s199_s4 = scalar_lea.sflag (!%p1630_p0), [#allocation3], %s1518_s2  ;;  %s1525_s11 = scalar_lea.vmem (!%p1630_p0), [#allocation2], %s1521_s10 }
  0x75   : > { %1273 = dma.done.wait (%p1631_p4), %s199_s4, 512  }
  0x76   : > { %1275 = vsyncadd (%p1631_p4), %s199_s4, 4294966784  ;;  %s207_s20 = sand.u32 1, %s1353_s16   ;;  %s1533_s9 = scalar_lea.vmem [#allocation5], %s1521_s10 }
  0x77   : > { %s208_s7 = scalar_lea.sflag [#allocation6], %s207_s20 }
  0x78   : > { %1277 = dma.done.wait (%p1631_p4), %s208_s7, 512  }
  0x79   : > { %1279 = vsyncadd (%p1631_p4), %s208_s7, 4294966784  ;;  %p1632_p11 = scmp.eq.s32.totalorder %s1353_s16, 0 }
  0x7b   : > { %1281 = dma.done.wait (%p1632_p11), [#allocation6], 4736   ;;  %p1633_p13 = pmov %p1632_p11 }
  0x7c   : > { %vm299_vm0 = vcmask 261120   ;;  %v254_v0 = vld [vmem:[#allocation7] sm:$0xff]  ;;  %v255_v1 = vld [vmem:[#allocation7 + $0x8] sm:$0xff]  ;;  %v256_v2 = vld [vmem:[#allocation7 + $0x10] sm:$0xff]  ;;  %vm655_vm9 = vcmask 1040384   ;;  %s847_s18 = sshll.u32 %s1353_s16, 9 }
  0x7d   : > { %1283 = vsyncadd (%p1633_p13), [#allocation6], 4294962560  ;;  %v986_v3 = vpack.c.bf16 %v255_v1, %v254_v0  ;;  %v257_v4 = vld [vmem:[#allocation7 + $0x18] sm:$0xff]  ;;  %v246_v5 = vld [vmem:[%s1525_s11] sm:$0xff]  ;;  %s242_s6 = scalar_lea.vmem [#allocation8], %s1521_s10  ;;  %s1560_s23 = scalar_lea.hbm %s1609_s3, %s847_s18 }
  0x7e   : > { %v990_v6 = vpack.c.bf16 %v257_v4, %v256_v2  ;;  %904 = vmatprep.mubr.msk.f32.mxu0 %vm299_vm0, %v246_v5  ;;  %v258_v7 = vld [vmem:[#allocation7 + $0x20] sm:$0xff]  ;;  %v259_v8 = vld [vmem:[#allocation7 + $0x28] sm:$0xff]  ;;  %v260_v9 = vld [vmem:[#allocation7 + $0x30] sm:$0xff]  ;;  %s700_s29 = sshll.u32 %s242_s6, 4  ;;  %s687_s16 = scalar_lea.sflag [#allocation4], %s1518_s2  ;;  %s1562_s29 = int_to_ptr.vmem [resolvable:$true] %s700_s29 }
  0x7f   : > { %987 = vmatprep.subr.bf16.mxu0 %v986_v3  ;;  %v261_v10 = vld [vmem:[#allocation7 + $0x38] sm:$0xff]  ;;  %v994_v11 = vpack.c.bf16 %v259_v8, %v258_v7  ;;  %v247_v13 = vld [vmem:[%s1525_s11 + $0x8] sm:$0xff]  ;;  %v248_v14 = vld [vmem:[%s1525_s11 + $0x10] sm:$0xff]  ;;  %s1228_s27 = scalar_lea.vmem %s1562_s29, 512  ;;  %s1309_s5 = smov [#allocation8]  }
  0x80   : > { %989 = vmatpush3.bf16.msra.mxu0 %v986_v3  ;;  %v998_v12 = vpack.c.bf16 %v261_v10, %v260_v9  ;;  %v249_v15 = vld [vmem:[%s1525_s11 + $0x18] sm:$0xff]  ;;  %v262_v16 = vld [vmem:[#allocation7 + $0x40] sm:$0xff]  ;;  %v263_v17 = vld [vmem:[#allocation7 + $0x48] sm:$0xff]  ;;  %p1229_p3 = scmp.ne.s32.totalorder %s1562_s29, %s1228_s27  ;;  %s1232_s8 = sshll.u32 %s1309_s5, 4  ;;  %s1233_s8 = int_to_ptr.vmem [resolvable:$false] %s1232_s8 }
  0x81   : > { %991 = vmatprep.subr.bf16.mxu0 %v990_v6  ;;  %995 = vmatprep.subr.bf16.mxu1 %v994_v11  ;;  %v1002_v18 = vpack.c.bf16 %v263_v17, %v262_v16  ;;  %v264_v19 = vld [vmem:[#allocation7 + $0x50] sm:$0xff]  ;;  %v265_v20 = vld [vmem:[#allocation7 + $0x58] sm:$0xff]  ;;  %v266_v22 = vld [vmem:[#allocation7 + $0x60] sm:$0xff]  ;;  %s1234_s28 = scalar_lea.vmem %s1233_s8, 1024  ;;  %p1235_p1 = scmp.lt.s32.totalorder %s1562_s29, %s1233_s8 }
  0x82   : > { %997 = vmatpush3.bf16.msra.mxu1 %v994_v11  ;;  %v1006_v21 = vpack.c.bf16 %v265_v20, %v264_v19  ;;  %v267_v23 = vld [vmem:[#allocation7 + $0x68] sm:$0xff]  ;;  %v268_v25 = vld [vmem:[#allocation7 + $0x70] sm:$0xff]  ;;  %v269_v26 = vld [vmem:[#allocation7 + $0x78] sm:$0xff]  ;;  %p1230_p7 = pnand %p1229_p3, %p1426_p12  ;;  %p1236_p5 = scmp.lt.s32.totalorder %s1234_s28, %s1228_s27 }
  0x83   : > { %999 = vmatprep.subr.bf16.mxu1 %v998_v12  ;;  %v1010_v24 = vpack.c.bf16 %v267_v23, %v266_v22  ;;  %v1014_v27 = vpack.c.bf16 %v269_v26, %v268_v25  ;;  %v270_v28 = vld [vmem:[#allocation7 + $0x80] sm:$0xff]  ;;  %v271_v29 = vld [vmem:[#allocation7 + $0x88] sm:$0xff]  ;;  %v272_v31 = vld [vmem:[#allocation7 + $0x90] sm:$0xff] }
  0x84   : > { %993 = vmatpush3.bf16.msra.mxu0 %v990_v6  ;;  %v1018_v30 = vpack.c.bf16 %v271_v29, %v270_v28  ;;  %v273_v32 = vld [vmem:[#allocation7 + $0x98] sm:$0xff]  ;;  %v274_v34 = vld [vmem:[#allocation7 + $0xa0] sm:$0xff]  ;;  %v275_v35 = vld [vmem:[#allocation7 + $0xa8] sm:$0xff]  ;;  %p1231_p9 = pneg %p1230_p7  ;;  %p1237_p2 = por %p1236_p5, %p1235_p1 }
  0x85   : > { %v1022_v33 = vpack.c.bf16 %v273_v32, %v272_v31  ;;  %v276_v36 = vld [vmem:[#allocation7 + $0xb0] sm:$0xff]  ;;  %v1026_v37 = vpack.c.bf16 %v275_v35, %v274_v34  ;;  %v277_v38 = vld [vmem:[#allocation7 + $0xb8] sm:$0xff]  ;;  %v820_v40 = vld [vmem:[#allocation7 + $0x120] ss:$0 sm:$0xff] }
  0x86   : > { %1001 = vmatpush3.bf16.msra.mxu1 %v998_v12  ;;  %v1030_v39 = vpack.c.bf16 %v277_v38, %v276_v36  ;;  %v278_v9 = vld [vmem:[#allocation7 + $0xc0] sm:$0xff]  ;;  %v279_v10 = vld [vmem:[#allocation7 + $0xc8] sm:$0xff]  ;;  %v280_v12 = vld [vmem:[#allocation7 + $0xd0] sm:$0xff]  ;;  %p1238_p6 = pnand %p1237_p2, %p1231_p9 }
  0x87   : > { %905 = vmatmul.mubr.msk.f32.vlgmr.msra.gmra.mrb[0].mxu0 %vm299_vm0, %v247_v13  ;;  %1003 = vmatprep.subr.bf16.mxu1 %v1002_v18  ;;  %v1034_v11 = vpack.c.bf16 %v279_v10, %v278_v9  ;;  %v281_v13 = vld [vmem:[#allocation7 + $0xd8] sm:$0xff]  ;;  %v283_v16 = vld [vmem:[#allocation7 + $0xe8] sm:$0xff] }
  0x88   : > { %907 = vmatprep.mubr.msk.f32.mxu0 %vm299_vm0, %v248_v14  ;;  %1027 = vmatprep.subr.bf16.mxu0 %v1026_v37  ;;  %v1038_v14 = vpack.c.bf16 %v281_v13, %v280_v12  ;;  %v285_v19 = vld [vmem:[#allocation7 + $0xf8] sm:$0xff]  ;;  %v287_v22 = vld [vmem:[#allocation7 + $0x108] sm:$0xff] }
  0x89   : > { %1029 = vmatpush3.bf16.msra.mxu0 %v1026_v37  ;;  %v289_v25 = vld [vmem:[#allocation7 + $0x118] sm:$0xff] }
  0x8a   : > { %1005 = vmatpush3.bf16.msra.mxu1 %v1002_v18  ;;  %1031 = vmatprep.subr.bf16.mxu0 %v1030_v39  ;;  %v284_v18 = vld [vmem:[#allocation7 + $0xf0] sm:$0xff] }
  0x8b   : > { %908 = vmatmul.mubr.msk.f32.gmra.mrb[2].mxu0 %vm299_vm0, %v249_v15  ;;  %1007 = vmatprep.subr.bf16.mxu1 %v1006_v21  ;;  %v282_v15 = vld [vmem:[#allocation7 + $0xe0] sm:$0xff]  ;;  %v1046_v20 = vpack.c.bf16 %v285_v19, %v284_v18 }
  0x8c   : > { %v1042_v17 = vpack.c.bf16 %v283_v16, %v282_v15  ;;  %v294_v19 = vld [vmem:[#allocation7 + $0x124] sm:$0x1] }
  0x8d   : > { %1033 = vmatpush3.bf16.msra.mxu0 %v1030_v39 }
  0x8e   : > { %1009 = vmatpush3.bf16.msra.mxu1 %v1006_v21  ;;  %1035 = vmatprep.subr.bf16.mxu0 %v1034_v11  ;;  %v286_v21 = vld [vmem:[#allocation7 + $0x100] sm:$0xff] }
  0x8f   : > { %1011 = vmatprep.subr.bf16.mxu1 %v1010_v24  ;;  %v1050_v23 = vpack.c.bf16 %v287_v22, %v286_v21  ;;  %v656_v22 = vsel %vm655_vm9, %v294_v19, 0.0 }
  0x91   : > { %1037 = vmatpush3.bf16.msra.mxu0 %v1034_v11  ;;  %v252_v11 = vld [vmem:[%s1533_s9 + $0x10] sm:$0xff] }
  0x92   : > { %1013 = vmatpush3.bf16.msra.mxu1 %v1010_v24  ;;  %1039 = vmatprep.subr.bf16.mxu0 %v1038_v14  ;;  %v288_v24 = vld [vmem:[#allocation7 + $0x110] sm:$0xff] }
  0x93   : > { %1015 = vmatprep.subr.bf16.mxu1 %v1014_v27  ;;  %v1054_v26 = vpack.c.bf16 %v289_v25, %v288_v24  ;;  %v663_v24 = vlaneseq }
  0x95   : > { %1041 = vmatpush3.bf16.msra.mxu0 %v1038_v14 }
  0x96   : > { %1017 = vmatpush3.bf16.msra.mxu1 %v1014_v27  ;;  %1043 = vmatprep.subr.bf16.mxu0 %v1042_v17  ;;  %v829_v27 = vld [vmem:[#allocation7 + $0x121] ss:$0 sm:$0xff] }
  0x97   : > { %1019 = vmatprep.subr.bf16.mxu1 %v1018_v30 }
  0x99   : > { %1045 = vmatpush3.bf16.msra.mxu0 %v1042_v17 }
  0x9a   : > { %1021 = vmatpush3.bf16.msra.mxu1 %v1018_v30  ;;  %1047 = vmatprep.subr.bf16.mxu0 %v1046_v20 }
  0x9b   : > { %1023 = vmatprep.subr.bf16.mxu1 %v1022_v33 }
  0x9d   : > { %1049 = vmatpush3.bf16.msra.mxu0 %v1046_v20 }
  0x9e   : > { %1025 = vmatpush3.bf16.msra.mxu1 %v1022_v33  ;;  %1051 = vmatprep.subr.bf16.mxu0 %v1050_v23 }
  0xa1   : > { %1053 = vmatpush3.bf16.msra.mxu0 %v1050_v23 }
  0xa2   : > { %1055 = vmatprep.subr.bf16.mxu0 %v1054_v26 }
  0xa5   : > { %1057 = vmatpush3.bf16.msra.mxu0 %v1054_v26  ;;  %v664_v26 = vshrl.u32 %v663_v24, 7 }
 0x15a   : > { %v906_v41 = vpop.f32.mrb[0].mxu0 }
 0x15b   : > { %v384_v42 = vadd.f32 %v906_v41, %v820_v40  ;;  %v378_v43 = vpop.f32.mrb[1].mxu0 }
 0x15c   : > { %v379_v44 = vadd.f32 %v820_v40, %v378_v43 }
 0x15d   : > { %v403_v45 = vmul.f32 1.442695, %v384_v42  ;;  %vm398_vm1 = vcmp.gt.f32.partialorder %v384_v42, 0.0 }
 0x15e   : > { %v401_v46 = vmul.f32 1.442695, %v379_v44  ;;  %v909_v47 = vpop.f32.mrb[2].mxu0  ;;  %vm397_vm2 = vcmp.gt.f32.partialorder %v379_v44, 0.0 }
 0x15f   : > { %1124 = vpow2.f32 %v403_v45  ;;  %v394_v48 = vadd.f32 %v909_v47, %v820_v40  ;;  %v388_v49 = vpop.f32.mrb[3].mxu0 }
 0x160   : > { %1126 = vpow2.f32 %v401_v46  ;;  %v389_v50 = vadd.f32 %v820_v40, %v388_v49 }
 0x161   : > { %v407_v51 = vmul.f32 1.442695, %v394_v48  ;;  %vm400_vm3 = vcmp.gt.f32.partialorder %v394_v48, 0.0 }
 0x162   : > { %v405_v52 = vmul.f32 1.442695, %v389_v50  ;;  %vm399_vm4 = vcmp.gt.f32.partialorder %v389_v50, 0.0 }
 0x163   : > { %1128 = vpow2.f32 %v407_v51 }
 0x164   : > { %1130 = vpow2.f32 %v405_v52 }
 0x169   : > { %v1125_v53 = vpop.eup %1124 }
 0x16a   : > { %v1127_v54 = vpop.eup %1126  ;;  %v826_v55 = vadd.f32 -1.0, %v1125_v53 }
 0x16b   : > { %v825_v56 = vadd.f32 -1.0, %v1127_v54 }
 0x16c   : > { %v414_v57 = vmul.f32 1.6732632, %v826_v55 }
 0x16d   : > { %v1129_v58 = vpop.eup %1128  ;;  %v413_v59 = vmul.f32 1.6732632, %v825_v56 }
 0x16e   : > { %v1131_v60 = vpop.eup %1130  ;;  %v828_v61 = vadd.f32 -1.0, %v1129_v58  ;;  %v418_v62 = vsel %vm398_vm1, %v384_v42, %v414_v57 }
 0x16f   : > { %v827_v63 = vadd.f32 -1.0, %v1131_v60  ;;  %v417_v0 = vsel %vm397_vm2, %v379_v44, %v413_v59  ;;  %v422_v3 = vmul.f32 1.050701, %v418_v62  ;;  %v834_v60 = vld [vmem:[#allocation7 + $0x122] ss:$0 sm:$0xff]  ;;  %v251_v62 = vld [vmem:[%s1533_s9 + $0x8] sm:$0xff] }
 0x170   : > { %v421_v1 = vmul.f32 1.050701, %v417_v0  ;;  %v416_v2 = vmul.f32 1.6732632, %v828_v61  ;;  %v250_v0 = vld [vmem:[%s1533_s9] sm:$0xff] }
 0x171   : > { %v415_v4 = vmul.f32 1.6732632, %v827_v63 }
 0x172   : > { %942 = vmatprep.mubr.f32.mxu1 %v421_v1  ;;  %v420_v5 = vsel %vm400_vm3, %v394_v48, %v416_v2 }
 0x173   : > { %943 = vmatmul.mubr.f32.vlgmr.msra.gmra.mrb[0].mxu1 %v422_v3  ;;  %v419_v6 = vsel %vm399_vm4, %v389_v50, %v415_v4  ;;  %v424_v8 = vmul.f32 1.050701, %v420_v5  ;;  %v835_v3 = vld [vmem:[#allocation7 + $0x123] ss:$0 sm:$0xff] }
 0x174   : > { %v423_v7 = vmul.f32 1.050701, %v419_v6 }
 0x176   : > { %945 = vmatprep.mubr.f32.mxu1 %v423_v7  ;;  %v253_v7 = vld [vmem:[%s1533_s9 + $0x18] sm:$0xff] }
 0x177   : > { %946 = vmatmul.mubr.f32.gmra.mrb[2].mxu1 %v424_v8 }
 0x246   : > { %v944_v28 = vpop.f32.mrb[0].mxu1 }
 0x247   : > { %v501_v29 = vadd.f32 %v944_v28, %v829_v27  ;;  %v495_v30 = vpop.f32.mrb[1].mxu1 }
 0x248   : > { %v496_v31 = vadd.f32 %v829_v27, %v495_v30  ;;  %v676_v30 = vand.u32 127, %v663_v24 }
 0x249   : > { %v520_v32 = vmul.f32 1.442695, %v501_v29  ;;  %vm515_vm5 = vcmp.gt.f32.partialorder %v501_v29, 0.0 }
 0x24a   : > { %v518_v33 = vmul.f32 1.442695, %v496_v31  ;;  %v947_v34 = vpop.f32.mrb[2].mxu1  ;;  %vm514_vm6 = vcmp.gt.f32.partialorder %v496_v31, 0.0  ;;  %vm677_vm10 = vcmp.eq.s32.totalorder %v676_v30, 9 }
 0x24b   : > { %1132 = vpow2.f32 %v520_v32  ;;  %v511_v35 = vadd.f32 %v947_v34, %v829_v27  ;;  %v505_v36 = vpop.f32.mrb[3].mxu1 }
 0x24c   : > { %1134 = vpow2.f32 %v518_v33  ;;  %v506_v37 = vadd.f32 %v829_v27, %v505_v36 }
 0x24d   : > { %v524_v38 = vmul.f32 1.442695, %v511_v35  ;;  %vm517_vm7 = vcmp.gt.f32.partialorder %v511_v35, 0.0 }
 0x24e   : > { %v522_v39 = vmul.f32 1.442695, %v506_v37  ;;  %vm516_vm8 = vcmp.gt.f32.partialorder %v506_v37, 0.0 }
 0x24f   : > { %1136 = vpow2.f32 %v524_v38 }
 0x250   : > { %1138 = vpow2.f32 %v522_v39 }
 0x255   : > { %v1133_v40 = vpop.eup %1132 }
 0x256   : > { %v1135_v41 = vpop.eup %1134  ;;  %v831_v42 = vadd.f32 -1.0, %v1133_v40 }
 0x257   : > { %v830_v43 = vadd.f32 -1.0, %v1135_v41 }
 0x258   : > { %v531_v44 = vmul.f32 1.6732632, %v831_v42 }
 0x259   : > { %v1137_v45 = vpop.eup %1136  ;;  %v530_v46 = vmul.f32 1.6732632, %v830_v43 }
 0x25a   : > { %v1139_v47 = vpop.eup %1138  ;;  %v535_v48 = vsel %vm515_vm5, %v501_v29, %v531_v44  ;;  %v833_v49 = vadd.f32 -1.0, %v1137_v45  ;;  %v665_v29 = vsub.s32 0, %v664_v26 }
 0x25b   : > { %v832_v50 = vadd.f32 -1.0, %v1139_v47  ;;  %v534_v51 = vsel %vm514_vm6, %v496_v31, %v530_v46  ;;  %v539_v54 = vmul.f32 1.050701, %v535_v48 }
 0x25c   : > { %v538_v52 = vmul.f32 1.050701, %v534_v51  ;;  %v533_v53 = vmul.f32 1.6732632, %v833_v49 }
 0x25d   : > { %v532_v55 = vmul.f32 1.6732632, %v832_v50 }
 0x25e   : > { %980 = vmatprep.mubr.f32.mxu0 %v538_v52  ;;  %v537_v56 = vsel %vm517_vm7, %v511_v35, %v533_v53 }
 0x25f   : > { %981 = vmatmul.mubr.f32.vlgmr.msra.gmra.mrb[4].mxu0 %v539_v54  ;;  %v536_v57 = vsel %vm516_vm8, %v506_v37, %v532_v55  ;;  %v541_v59 = vmul.f32 1.050701, %v537_v56 }
 0x260   : > { %v540_v58 = vmul.f32 1.050701, %v536_v57 }
 0x262   : > { %983 = vmatprep.mubr.f32.mxu0 %v540_v58 }
 0x263   : > { %984 = vmatmul.mubr.f32.gmra.mrb[6].mxu0 %v541_v59 }
 0x332   : > { %v982_v61 = vpop.f32.mrb[4].mxu0 }
 0x333   : > { %v618_v63 = vadd.f32 %v982_v61, %v834_v60  ;;  %v612_v1 = vpop.f32.mrb[5].mxu0 }
 0x334   : > { %v613_v2 = vadd.f32 %v834_v60, %v612_v1 }
 0x335   : > { %v632_v4 = vsub.f32 %v251_v62, %v618_v63 }
 0x336   : > { %v631_v5 = vsub.f32 %v250_v0, %v613_v2  ;;  %v985_v6 = vpop.f32.mrb[6].mxu0 }
 0x337   : > { %v628_v8 = vadd.f32 %v985_v6, %v834_v60  ;;  %v622_v9 = vpop.f32.mrb[7].mxu0  ;;  %v640_v10 = vmul.f32 %v835_v3, %v632_v4 }
 0x338   : > { %v623_v12 = vadd.f32 %v834_v60, %v622_v9  ;;  %v639_v14 = vmul.f32 %v835_v3, %v631_v5 }
 0x339   : > { %v644_v13 = vmul.f32 %v640_v10, %v640_v10  ;;  %v634_v15 = vsub.f32 %v253_v7, %v628_v8 }
 0x33a   : > { %v633_v16 = vsub.f32 %v252_v11, %v623_v12  ;;  %v643_v18 = vmul.f32 %v639_v14, %v639_v14 }
 0x33b   : > { %649 = vadd.xlane.f32.xlu0 %v644_v13  ;;  %v642_v21 = vmul.f32 %v835_v3, %v634_v15 }
 0x33c   : > { %v641_v17 = vmul.f32 %v835_v3, %v633_v16 }
 0x33d   : > { %v646_v23 = vmul.f32 %v642_v21, %v642_v21 }
 0x33e   : > { %v645_v20 = vmul.f32 %v641_v17, %v641_v17 }
 0x33f   : > { %647 = vadd.xlane.f32.xlu0 %v643_v18 }
 0x340   : > { %651 = vadd.xlane.f32.xlu1 %v645_v20 }
 0x343   : > { %657 = vadd.xlane.f32.xlu0 %v656_v22 }
 0x344   : > { %653 = vadd.xlane.f32.xlu1 %v646_v23 }
 0x3c8   : > { %v650_v25 = vpop.xlane.xlu0 %649 }
 0x3c9   : > { %v660_v32 = vmul.f32 -0.5, %v650_v25 }
 0x3cc   : > { %v648_v27 = vpop.xlane.xlu0 %647 }
 0x3cd   : > { %v652_v28 = vpop.xlane.xlu1 %651  ;;  %v659_v33 = vmul.f32 -0.5, %v648_v27 }
 0x3ce   : > { %v661_v34 = vmul.f32 -0.5, %v652_v28 }
 0x3d0   : > { %v658_v31 = vpop.xlane.xlu0 %657 }
 0x3d1   : > { %v666_v35 = vrot.slane %v658_v31, %v665_v29  ;;  %v654_v36 = vpop.xlane.xlu1 %653 }
 0x3d2   : > { %v662_v37 = vmul.f32 -0.5, %v654_v36 }
 0x3d3   : > { %v667_v38 = vsub.f32 %v659_v33, %v666_v35  ;;  %v668_v39 = vsub.f32 %v660_v32, %v666_v35  ;;  %v669_v40 = vsub.f32 %v661_v34, %v666_v35 }
 0x3d4   : > { %v670_v41 = vsub.f32 %v662_v37, %v666_v35 }
 0x3d5   : > { %v836_v42 = vadd.f32 -7.351508, %v667_v38  ;;  %v837_v43 = vadd.f32 -7.351508, %v668_v39  ;;  %v838_v44 = vadd.f32 -7.351508, %v669_v40 }
 0x3d6   : > { %v839_v45 = vadd.f32 -7.351508, %v670_v41 }
 0x3d7   : > { %v678_v46 = vsel %vm677_vm10, %v836_v42, %v613_v2  ;;  %v679_v47 = vsel %vm677_vm10, %v837_v43, %v618_v63  ;;  %v680_v48 = vsel %vm677_vm10, %v838_v44, %v623_v12 }
 0x3d8   : > { %682 = vst [vmem:[%s242_s6] sm:$0xff] %v678_v46  ;;  %683 = vst [vmem:[%s242_s6 + $0x8] sm:$0xff] %v679_v47  ;;  %v681_v49 = vsel %vm677_vm10, %v839_v45, %v628_v8 }
 0x3d9   : > { %684 = vst [vmem:[%s242_s6 + $0x10] sm:$0xff] %v680_v48  ;;  %685 = vst [vmem:[%s242_s6 + $0x18] sm:$0xff] %v681_v49 }
 0x3da   : > { %1241 = shalt.err (!%p1238_p6)
}
 0x3db   : > { %s1242_s22 = scalar_lea.hbm %s1560_s23, 512  ;;  %s1246_s10 = scalar_lea.hbm %s1609_s3, 1024 }
 0x3dc   : > { %p1243_p8 = scmp.ne.s32.totalorder %s1560_s23, %s1242_s22  ;;  %p1247_p4 = scmp.lt.u32.totalorder %s1560_s23, %s1609_s3 }
 0x3dd   : > { %p1248_p11 = scmp.lt.u32.totalorder %s1246_s10, %s1242_s22  ;;  %p1250_p3 = scmp.lt.u32.totalorder %s1242_s22, %s1560_s23 }
 0x3de   : > { %p1244_p10 = pnand %p1243_p8, %p1426_p12 }
 0x3df   : > { %p1249_p13 = por %p1248_p11, %p1247_p4 }
 0x3e0   : > { %p1245_p0 = pneg %p1244_p10 }
 0x3e1   : > { %p1251_p7 = por %p1250_p3, %p1249_p13 }
 0x3e3   : > { %p1252_p9 = pnand %p1251_p7, %p1245_p0 }
 0x3e5   : > { %1255 = shalt.err (!%p1252_p9)
}
 0x3e6   : > { %s1310_s20 = smov 128   ;;  %s1311_s7 = smov 8  }
 0x3e7   : > { %1066 = dma.vmem_to_hbm [thread:$0]  (%p1426_p12), %s1562_s29, 512, %s1560_s23, %s687_s16, %s1310_s20, %s1310_s20, %s1311_s7  }
 0x3e8 PF: > { %s715_s9 = sand.u32 1, %s1290_s12   ;;  %p1634_p1 = scmp.ne.s32.totalorder %s1620_s19, 0 }
 0x3e9   : > { %p1635_p5 = scmp.ge.s32.totalorder %s1302_s15, 2  ;;  %s716_s18 = scalar_lea.sflag [#allocation4], %s715_s9 }
 0x3eb   : > { %p1080_p2 = pnand %p1635_p5, %p1634_p1 }
 0x3ed   : > { %1285 = dma.done.wait (!%p1080_p2), %s716_s18, 512  }
 0x3ee   : > { %1287 = vsyncadd (!%p1080_p2), %s716_s18, 4294966784  ;;  %p19_p6 = scmp.ge.s32.totalorder %s1388_s24, 4   ;;  %s1636_s12 = smov %s1294_s13 }
 0x3ef   : > { %s1637_s13 = smov %s1298_s14  ;;  %s1638_s14 = smov %s1422_s17 }
 0x3f0   : > { %s1639_s15 = smov %s1388_s24  ;;  %21 = sbr.rel (!%p19_p6) target bundleno = 10 (0xa), region = 94 }
 0x3f7   :  { %721 = vsyncpa [#allocation3], 1 }
 0x3f8   :  { %723 = vsyncpa [#allocation3 + $0x1], 1 }
 0x3f9   :  { %724 = vsyncpa [#allocation6], 1 }
 0x3fa   :  { %726 = vsyncpa [#allocation6 + $0x1], 1 }
 0x3fb   :  { %727 = vsyncpa [#allocation4], 1 }
 0x3fc   :  { %729 = vsyncpa [#allocation4 + $0x1], 1 }

</bundles_post_ra>
